<compile_context>
chip_gen: v7x
topology: tpu7x:2x2x1
jax: 0.10.0
libtpu: 0.0.40
codegen_flags: <defaults>
</compile_context>

<pallas_src>
import functools

import jax
import jax.numpy as jnp
from jax.experimental import pallas as pl
from jax.experimental.pallas import tpu as pltpu

LANE = 128


def _round_up(x, m):
    return (x + m - 1) // m * m


def _pool_out_size(w_in, kernel_size, stride, padding, dilation, ceil_mode):
    eff = dilation * (kernel_size - 1)
    num = w_in + 2 * padding - eff - 1
    if ceil_mode:
        w_out = -(-num // stride) + 1
        # PyTorch rule: last window must start inside the (left-padded) input.
        if (w_out - 1) * stride >= w_in + padding:
            w_out -= 1
    else:
        w_out = num // stride + 1
    return w_out


def _maxpool1d_kernel(xp_ref, o_ref, *, kernel_size, stride, dilation,
                      w_out_pad, phase_to_idx):
    # xp_ref: (n_phases, ROW_BLOCK, wc)  phase-decomposed, pad-filled input
    # o_ref : (ROW_BLOCK, w_out_pad)     lane-dense output tile
    acc = None
    for k in range(kernel_size):                # static, small, unrolled
        off = k * dilation
        r, q = off % stride, off // stride      # static Python ints
        cand = xp_ref[phase_to_idx[r], :, pl.ds(q, w_out_pad)]
        acc = cand if acc is None else jnp.maximum(acc, cand)
    o_ref[...] = acc.astype(o_ref.dtype)


def max_pool1d(x, kernel_size, stride=None, padding=0, dilation=1,
               ceil_mode=False, return_indices=False):
    """x: (N, C, W) -> (N, C, W_out). Matches torch.nn.MaxPool1d forward."""
    # TODO(synk): return_indices=True (argmax index output) not implemented.
    assert not return_indices
    kernel_size = int(kernel_size)
    stride = int(stride) if stride is not None else kernel_size
    padding = int(padding)
    dilation = int(dilation)

    if x.dtype == jnp.bool_:
        raise TypeError("max_pool1d: bool inputs are not supported")

    n, c, w_in = x.shape
    w_out = _pool_out_size(w_in, kernel_size, stride, padding, dilation, ceil_mode)
    assert w_out > 0

    itemsize = jnp.dtype(x.dtype).itemsize
    sub = max(8, 32 // itemsize)          # packed sublanes: 8 f32 / 16 bf16 / 32 i8

    nc = n * c
    w_out_pad = _round_up(w_out, LANE)    # lane-dense, unmasked output stores
    q_max = ((kernel_size - 1) * dilation) // stride
    wc = _round_up(w_out_pad + q_max, LANE)

    # Only the phases the kernel actually reads (skip never-touched phases,
    # e.g. 33% of the data at kernel_size=2, stride=3).
    used_phases = sorted({(k * dilation) % stride for k in range(kernel_size)})
    n_phases = len(used_phases)
    phase_to_idx = {p: i for i, p in enumerate(used_phases)}
    max_phase = used_phases[-1]

    # ---- row-block (grid-step) sizing -------------------------------------
    # Pure HBM-bandwidth bound: big blocks amortize the ~0.35 us/step pipeline
    # overhead.  Budget ~8 MiB per (input+output) block so the double-buffered
    # working set stays well under v7x's 64 MiB VMEM.
    # TODO(synk): for extremely long W a width-tiling grid axis (+ q_max halo)
    # would be needed instead of holding the whole wc per block.
    bytes_per_row = (n_phases * wc + w_out_pad) * itemsize
    budget = 8 * 1024 * 1024
    rb = max(sub, (budget // bytes_per_row) // sub * sub)
    rb = min(rb, _round_up(nc, sub))
    # Keep >=2 grid steps when possible so ("parallel",) can use both
    # TensorCores on v7x and DMA/compute still overlap.
    if _round_up(nc, sub) >= 2 * sub:
        rb = min(rb, _round_up(-(-nc // 2), sub))
    nc_pad = _round_up(nc, rb)
    grid = nc_pad // rb

    # ---- build the (phase, row, col) input view ---------------------------
    if jnp.issubdtype(x.dtype, jnp.floating):
        pad_val = -jnp.inf
    else:
        pad_val = jnp.iinfo(x.dtype).min   # identity for integer max

    # Columns of the padded signal the kernel can ever touch:
    #   max read index = (wc - 1) * stride + max_phase.
    src_needed = (wc - 1) * stride + max_phase + 1
    # Input columns past (src_needed - padding) can never enter any window
    # (wc >= w_out_pad + q_max covers every read), so dropping them is safe.
    keep = min(w_in, max(0, src_needed - padding))
    right_pad = src_needed - padding - keep
    assert right_pad >= 0, "internal: padded width does not cover kernel reads"

    x2 = x.reshape(nc, w_in)[:, :keep]
    padded = jnp.pad(x2, ((0, nc_pad - nc), (padding, right_pad)),
                     mode="constant", constant_values=pad_val)  # (nc_pad, src_needed)

    if stride == 1:
        xp = padded[None]                                  # free reshape, no copy
    else:
        # Single fused pad + decimate pass; xp[i, :, t] = padded[:, t*stride + phase_i]
        xp = jnp.stack([padded[:, r::stride][:, :wc] for r in used_phases],
                       axis=0)                             # (n_phases, nc_pad, wc)

    kernel = functools.partial(
        _maxpool1d_kernel, kernel_size=kernel_size, stride=stride,
        dilation=dilation, w_out_pad=w_out_pad, phase_to_idx=phase_to_idx)

    # ---- VMEM budgeting (generation-aware) --------------------------------
    block_bytes = (n_phases * rb * wc + rb * w_out_pad) * itemsize
    try:
        vmem_cap = int(pltpu.get_tpu_info().vmem_capacity_bytes)
    except Exception:
        vmem_cap = 128 * 1024 * 1024
    vmem_limit = int(min(max(4 * block_bytes + (2 << 20), 32 * 1024 * 1024),
                         int(0.75 * vmem_cap)))

    cost = pl.CostEstimate(
        flops=int(nc_pad) * int(w_out_pad) * max(kernel_size - 1, 1),
        transcendentals=0,
        bytes_accessed=int(xp.size) * itemsize + int(nc_pad) * int(w_out_pad) * itemsize,
    )

    out = pl.pallas_call(
        kernel,
        out_shape=jax.ShapeDtypeStruct((nc_pad, w_out_pad), x.dtype),
        grid=(grid,),
        in_specs=[pl.BlockSpec((n_phases, rb, wc), lambda i: (0, i, 0))],
        out_specs=pl.BlockSpec((rb, w_out_pad), lambda i: (i, 0)),
        compiler_params=pltpu.CompilerParams(
            dimension_semantics=("parallel",),
            vmem_limit_bytes=vmem_limit),
        cost_estimate=cost,
    )(xp)

    return out[:nc, :w_out].reshape(n, c, w_out)


def _ref_maxpool1d(x, kernel_size, stride=None, padding=0, dilation=1,
                   ceil_mode=False):
    """Pure-JAX reference via lax.reduce_window (handles ceil_mode/ints)."""
    stride = stride if stride is not None else kernel_size
    n, c, w_in = x.shape
    w_out = _pool_out_size(w_in, kernel_size, stride, padding, dilation, ceil_mode)
    if jnp.issubdtype(x.dtype, jnp.floating):
        init = jnp.array(-jnp.inf, dtype=x.dtype)
    else:
        init = jnp.array(jnp.iinfo(x.dtype).min, dtype=x.dtype)
    extra = max(0, (w_out - 1) * stride + dilation * (kernel_size - 1) + 1
                - (w_in + 2 * padding))
    return jax.lax.reduce_window(
        x, init, jax.lax.max,
        window_dimensions=(1, 1, kernel_size),
        window_strides=(1, 1, stride),
        padding=((0, 0), (0, 0), (padding, padding + extra)),
        window_dilation=(1, 1, dilation))


if __name__ == "__main__":
    key = jax.random.PRNGKey(0)
    kx, ki = jax.random.split(key)
    N, C, W = 2, 8, 50
    x_f32 = jax.random.normal(kx, (N, C, W), dtype=jnp.float32)
    x_bf16 = x_f32.astype(jnp.bfloat16)
    x_i32 = jax.random.randint(ki, (N, C, W), -1000, 1000, dtype=jnp.int32)

    cases = [
        (x_f32, dict(kernel_size=3, stride=2, padding=1, dilation=1)),
        (x_f32, dict(kernel_size=2, stride=2, padding=0, dilation=1)),
        (x_f32, dict(kernel_size=3, stride=1, padding=1, dilation=2)),
        (x_f32, dict(kernel_size=2, stride=3, padding=0, dilation=1)),     # unused phase pruning
        (x_f32, dict(kernel_size=3, stride=2, padding=1, dilation=1, ceil_mode=True)),
        (x_bf16, dict(kernel_size=3, stride=2, padding=1, dilation=1)),    # 16-bit packing
        (x_i32, dict(kernel_size=2, stride=2, padding=0, dilation=1)),     # integer dtype
    ]
    for x, cfg in cases:
        out = jax.block_until_ready(max_pool1d(x, **cfg))
        ref = _ref_maxpool1d(x, **cfg)
        assert out.shape == ref.shape, (cfg, out.shape, ref.shape)
        assert bool(jnp.array_equal(out, ref)), f"mismatch for {cfg} dtype={x.dtype}"

    print("KERNEL_OK")
</pallas_src>

<mosaic_0001>
module attributes {stable_mosaic.version = 11 : i64} {
  func.func @_maxpool1d_kernel(%arg0: i32, %arg1: memref<2x8x256xf32, #tpu.memory_space<vmem>>, %arg2: memref<8x128xf32, #tpu.memory_space<vmem>>) attributes {dimension_semantics = [#tpu.dimension_semantics<parallel>], iteration_bounds = array<i64: 2>, scalar_prefetch = 0 : i64, scratch_operands = 0 : i64, tpu.core_type = #tpu.core_type<tc>, window_params = [{transform_indices = @transform_0, window_bounds = array<i64: 2, 8, 256>}, {transform_indices = @transform_1, window_bounds = array<i64: 8, 128>}]} {
    %c0 = arith.constant 0 : index
    %c0_0 = arith.constant 0 : index
    %c0_1 = arith.constant 0 : index
    %0 = vector.load %arg1[%c0, %c0_0, %c0_1] : memref<2x8x256xf32, #tpu.memory_space<vmem>>, vector<1x8x128xf32>
    %1 = vector.shape_cast %0 : vector<1x8x128xf32> to vector<8x128xf32>
    %c1 = arith.constant 1 : index
    %c0_2 = arith.constant 0 : index
    %c0_3 = arith.constant 0 : index
    %2 = vector.load %arg1[%c1, %c0_2, %c0_3] : memref<2x8x256xf32, #tpu.memory_space<vmem>>, vector<1x8x128xf32>
    %3 = vector.shape_cast %2 : vector<1x8x128xf32> to vector<8x128xf32>
    %4 = arith.maximumf %1, %3 : vector<8x128xf32>
    %c0_4 = arith.constant 0 : index
    %c0_5 = arith.constant 0 : index
    %c1_6 = arith.constant 1 : index
    %5 = vector.load %arg1[%c0_4, %c0_5, %c1_6] : memref<2x8x256xf32, #tpu.memory_space<vmem>>, vector<1x8x128xf32>
    %6 = vector.shape_cast %5 : vector<1x8x128xf32> to vector<8x128xf32>
    %7 = arith.maximumf %4, %6 : vector<8x128xf32>
    %c0_7 = arith.constant 0 : index
    %c0_8 = arith.constant 0 : index
    %8 = vector.load %arg2[%c0_7, %c0_8] : memref<8x128xf32, #tpu.memory_space<vmem>>, vector<8x128xf32>
    tpu.vector_store %arg2[%c0_7, %c0_8], %7 {strides = array<i32>} : memref<8x128xf32, #tpu.memory_space<vmem>>, vector<8x128xf32>,
    return
  }
  func.func @transform_0(%arg0: i32) -> (i32, i32, i32) {
    %c0_i32 = arith.constant 0 : i32
    %c0_i32_0 = arith.constant 0 : i32
    %c0_i32_1 = arith.constant 0 : i32
    return %c0_i32, %arg0, %c0_i32_0 : i32, i32, i32
  }
  func.func @transform_1(%arg0: i32) -> (i32, i32) {
    %c0_i32 = arith.constant 0 : i32
    %c0_i32_0 = arith.constant 0 : i32
    return %arg0, %c0_i32 : i32, i32
  }
}

</mosaic_0001>

<bundles_post_ra>
// kernel: tpu_custom_call.1
= control target key start
LH: loop header
LB: loop body
LE: loop exit
PB: predicated region body
PF: predicated region fallthrough
CT: control target
= control target key end

     0   :  { %6 = vsyncpa [#allocation3], 0  ;;  %s577_s0 = inlined_call_operand.hbm [shape: f32[2,16,256], index: 0, kind: input, shape index: {}]   ;;  %s578_s1 = inlined_call_operand.hbm [shape: f32[16,128], index: 1, kind: output, shape index: {}]  }
   0x1   :  { %8 = vsyncpa [#allocation3 + $0x1], 0 }
   0x2   :  { %9 = vsyncpa [#allocation4], 0 }
   0x3   :  { %11 = vsyncpa [#allocation4 + $0x1], 0  ;;  %s414_s6 = smov 0   ;;  %s416_s7 = smov 0  }
   0x4   :  { %s418_s8 = smov 0   ;;  %s420_s9 = smov 0  }
   0x5 LB: > { %s435_s10 = sadd.s32 4294967295, %s396_s9   ;;  %s235_s11 = sadd.s32 4294967294, %s396_s9   ;;  %s396_s9 = sphi %s420_s9, %s592_s9   ;;  %s392_s8 = sphi %s418_s8, %s591_s8   ;;  %s388_s7 = sphi %s416_s7, %s590_s7   ;;  %s384_s6 = sphi %s414_s6, %s589_s6  }
   0x6   : > { %s439_s12 = sadd.s32 1, %s396_s9   ;;  %s24_s13 = sadd.s32 1, %s392_s8 }
   0x7   : > { %s21_s14 = ssub.s32 %s396_s9, %s439_s12  ;;  %p31_p0 = scmp.ne.s32.totalorder %s392_s8, %s388_s7 }
   0x8   : > { %p22_p1 = scmp.eq.s32.totalorder %s21_s14, 0  ;;  %p32_p2 = scmp.eq.s32.totalorder %s396_s9, 0 }
   0x9   : > { %p37_p3 = scmp.ne.s32.totalorder %s388_s7, %s384_s6  ;;  %p38_p4 = scmp.eq.s32.totalorder %s435_s10, 0 }
   0xa   : > { %s451_s15 = scalar_select %p22_p1, %s392_s8, %s24_s13  }
   0xb   : > { %p453_p5 = por %p32_p2, %p31_p0  ;;  %p457_p6 = por %p38_p4, %p37_p3 }
   0xc   : > { %p61_p7 = scmp.eq.s32.totalorder %s435_s10, 1  ;;  %p67_p8 = scmp.eq.s32.totalorder %s235_s11, 1 }
   0xd   : > { %p262_p10 = scmp.lt.s32.totalorder %s396_s9, 2  ;;  %s87_s20 = sand.u32 1, %s392_s8  }
   0xe   : > { %p464_p11 = por %p61_p7, %p31_p0  ;;  %p468_p12 = por %p67_p8, %p37_p3 }
   0xf   : > { %s249_s21 = sshll.u32 %s396_s9, 8  ;;  %s238_s22 = sshll.u32 %s87_s20, 5 }
  0x10   : > { %s582_s18 = scalar_select %p464_p11, 1, 0 }
  0x11   : > { %s583_s19 = scalar_select %p468_p12, 1, 0 }
  0x12   : > { %s477_s25 = scalar_lea.hbm %s577_s0, %s249_s21  ;;  %s91_s26 = scalar_lea.vmem [#allocation2], %s238_s22 }
  0x13   : > { %s98_s27 = sshll.u32 %s91_s26, 4  ;;  %p481_p13 = pnand %p262_p10, %p453_p5  ;;  %s485_s27 = int_to_ptr.vmem [resolvable:$true] %s98_s27 }
  0x14   : > { %s488_s29 = scalar_lea.sflag [#allocation3], %s87_s20  ;;  %s300_s30 = scalar_lea.hbm %s477_s25, 512 }
  0x15   : > { %p301_p1 = scmp.ne.s32.totalorder %s477_s25, %s300_s30  ;;  %p302_p2 = pneg %p481_p13 }
  0x16   : > { %s305_s4 = scalar_lea.hbm %s577_s0, 1024  ;;  %p306_p5 = scmp.lt.u32.totalorder %s477_s25, %s577_s0 }
  0x17   : > { %p303_p3 = pnand %p302_p2, %p301_p1  ;;  %p307_p7 = scmp.lt.u32.totalorder %s305_s4, %s300_s30 }
  0x18   : > { %p309_p10 = scmp.lt.u32.totalorder %s300_s30, %s477_s25 }
  0x19   : > { %p304_p4 = pneg %p303_p3  ;;  %p308_p8 = por %p307_p7, %p306_p5 }
  0x1b   : > { %p310_p9 = por %p309_p10, %p308_p8 }
  0x1d   : > { %p311_p0 = pnand %p310_p9, %p304_p4 }
  0x1f   : > { %314 = shalt.err (!%p311_p0)
}
  0x20   : > { %s315_s13 = scalar_lea.vmem %s485_s27, 512  ;;  %s398_s14 = smov [#allocation2]  }
  0x21   : > { %p316_p1 = scmp.ne.s32.totalorder %s485_s27, %s315_s13  ;;  %s320_s16 = sshll.u32 %s398_s14, 4  ;;  %s321_s16 = int_to_ptr.vmem [resolvable:$false] %s320_s16 }
  0x22   : > { %s322_s20 = scalar_lea.vmem %s321_s16, 1024  ;;  %p323_p11 = scmp.lt.s32.totalorder %s485_s27, %s321_s16 }
  0x23   : > { %p318_p3 = pnand %p316_p1, %p302_p2  ;;  %p324_p5 = scmp.lt.s32.totalorder %s322_s20, %s315_s13 }
  0x25   : > { %p319_p12 = pneg %p318_p3  ;;  %p325_p7 = por %p324_p5, %p323_p11 }
  0x27   : > { %p326_p8 = pnand %p325_p7, %p319_p12 }
  0x29   : > { %329 = shalt.err (!%p326_p8)
}
  0x2a   : > { %s399_s21 = smov 512   ;;  %s400_s22 = smov 256  }
  0x2b   : > { %s401_s23 = smov 16   ;;  %p106_p9 = scmp.lt.s32.totalorder %s396_s9, 3 }
  0x2c   : > { %257 = dma.hbm_to_vmem [thread:$0]  (!%p481_p13), %s477_s25, 512, %s485_s27, %s488_s29, %s399_s21, %s400_s22, %s401_s23  }
  0x2d   : > { %p585_p0 = scmp.ge.s32.totalorder %s396_s9, 1 }
  0x2f   : > { %p107_p2 = pnand %p585_p0, %p106_p9 }
  0x30   : > { %s520_s24 = sand.u32 (!%p107_p2), 1, %s388_s7  }
  0x31   : > { %110 = sbr.rel (%p107_p2) target bundleno = 194 (0xc2), region = 24  ;;  %s242_s26 = sshll.u32 (!%p107_p2), %s520_s24, 5 }
  0x32   : > { %s113_s30 = scalar_lea.sflag (!%p107_p2), [#allocation3], %s520_s24  ;;  %s116_s2 = scalar_lea.vmem (!%p107_p2), [#allocation2], %s242_s26 }
  0x38   : > { %375 = dma.done.wait (%p457_p6), %s113_s30, 512  }
  0x39   : > { %377 = vsyncadd (%p457_p6), %s113_s30, 4294966784  ;;  %v135_v0 = vld [vmem:[%s116_s2] sm:$0xff]  ;;  %s402_s25 = smov 127   ;;  %v139_v1 = vld [vmem:[%s116_s2 + $0x8] sm:$0xff]  ;;  %s243_s27 = sshll.u32 %s520_s24, 3  ;;  %vm146_vm0 = vcmask 1039360  }
  0x3a   : > { %142 = vrot.lane.b32.xlu0 %v135_v0, %s402_s25  ;;  %v244_v2 = vld [vmem:[%s116_s2 + $0x10] sm:$0xff]  ;;  %s246_s28 = sshll.u32 %s435_s10, 7  ;;  %s134_s29 = scalar_lea.vmem [#allocation5], %s243_s27 }
  0x3b   : > { %v138_v4 = vmax.f32 %v135_v0, %v244_v2  ;;  %s165_s3 = sshll.u32 %s134_s29, 4  ;;  %s533_s5 = scalar_lea.hbm %s578_s1, %s246_s28  ;;  %s535_s3 = int_to_ptr.vmem [resolvable:$true] %s165_s3 }
  0x3c   : > { %s152_s11 = scalar_lea.sflag [#allocation4], %s520_s24  ;;  %s330_s13 = scalar_lea.vmem %s535_s3, 128 }
  0x3d   : > { %p331_p6 = scmp.ne.s32.totalorder %s535_s3, %s330_s13  ;;  %p586_p11 = scmp.ne.s32.totalorder %s582_s18, 0 }
  0x3e   : > { %144 = vrot.lane.b32.xlu0 %v139_v1, %s402_s25  ;;  %s403_s10 = smov [#allocation5]  }
  0x3f   : > { %p332_p12 = pnand %p331_p6, %p586_p11  ;;  %s334_s14 = sshll.u32 %s403_s10, 4  ;;  %s335_s14 = int_to_ptr.vmem [resolvable:$false] %s334_s14 }
  0x40   : > { %s336_s16 = scalar_lea.vmem %s335_s14, 256  ;;  %p337_p4 = scmp.lt.s32.totalorder %s535_s3, %s335_s14 }
  0x41   : > { %p333_p13 = pneg %p332_p12  ;;  %p338_p10 = scmp.lt.s32.totalorder %s336_s16, %s330_s13 }
  0x43   : > { %p339_p1 = por %p338_p10, %p337_p4 }
  0x45   : > { %p340_p3 = pnand %p339_p1, %p333_p13 }
  0xac   : > { %v143_v3 = vpop.permute.xlu0 %142 }
  0xb0   : > { %v145_v5 = vpop.permute.xlu0 %144 }
  0xb1   : > { %v147_v6 = vsel %vm146_vm0, %v143_v3, %v145_v5 }
  0xb2   : > { %v149_v7 = vmax.f32 %v138_v4, %v147_v6 }
  0xb4   : > { %150 = vst [vmem:[%s134_s29] sm:$0xff] %v149_v7 }
  0xb5   : > { %343 = shalt.err (!%p340_p3)
}
  0xb6   : > { %s344_s20 = scalar_lea.hbm %s533_s5, 128  ;;  %s348_s23 = scalar_lea.hbm %s578_s1, 256 }
  0xb7   : > { %p345_p5 = scmp.ne.s32.totalorder %s533_s5, %s344_s20  ;;  %p349_p9 = scmp.lt.u32.totalorder %s533_s5, %s578_s1 }
  0xb8   : > { %p350_p0 = scmp.lt.u32.totalorder %s348_s23, %s344_s20  ;;  %p352_p6 = scmp.lt.u32.totalorder %s344_s20, %s533_s5 }
  0xb9   : > { %p346_p7 = pnand %p345_p5, %p586_p11 }
  0xba   : > { %p351_p2 = por %p350_p0, %p349_p9 }
  0xbb   : > { %p347_p8 = pneg %p346_p7 }
  0xbc   : > { %p353_p12 = por %p352_p6, %p351_p2 }
  0xbe   : > { %p354_p13 = pnand %p353_p12, %p347_p8 }
  0xc0   : > { %357 = shalt.err (!%p354_p13)
}
  0xc1   : > { %252 = dma.vmem_to_hbm [thread:$0]  (%p586_p11), %s535_s3, 128, %s533_s5, %s152_s11  }
  0xc2 PF: > { %s177_s30 = sand.u32 1, %s384_s6   ;;  %p587_p4 = scmp.ne.s32.totalorder %s583_s19, 0 }
  0xc3   : > { %p588_p10 = scmp.ge.s32.totalorder %s396_s9, 2  ;;  %s178_s2 = scalar_lea.sflag [#allocation4], %s177_s30 }
  0xc5   : > { %p259_p1 = pnand %p588_p10, %p587_p4 }
  0xc7   : > { %379 = dma.done.wait (!%p259_p1), %s178_s2, 128  }
  0xc8   : > { %381 = vsyncadd (!%p259_p1), %s178_s2, 4294967168  ;;  %p14_p3 = scmp.ge.s32.totalorder %s439_s12, 4   ;;  %s589_s6 = smov %s388_s7 }
  0xc9   : > { %s590_s7 = smov %s392_s8  ;;  %s591_s8 = smov %s451_s15 }
  0xca   : > { %s592_s9 = smov %s439_s12  ;;  %16 = sbr.rel (!%p14_p3) target bundleno = 5 (0x5), region = 70 }
  0xd1   :  { %183 = vsyncpa [#allocation3], 1 }
  0xd2   :  { %185 = vsyncpa [#allocation3 + $0x1], 1 }
  0xd3   :  { %186 = vsyncpa [#allocation4], 1 }
  0xd4   :  { %188 = vsyncpa [#allocation4 + $0x1], 1 }

</bundles_post_ra>
